<compile_context>
chip_gen: v6e
topology: v6e:2x2x1
jax: 0.10.0
libtpu: 0.0.40
codegen_flags: <defaults>
</compile_context>

<pallas_src>
import functools

import jax
import jax.numpy as jnp
from jax.experimental import pallas as pl
from jax.experimental.pallas import tpu as pltpu

LANE = 128


def _round_up(n, m):
    return ((n + m - 1) // m) * m


def _flash_vmem_bytes(tq, tk, c_pad, d_pad, esz):
    """Rough VMEM footprint of the flash kernel (double-buffered IO + scratch)."""
    in_out = 2 * (tq * c_pad * 4          # x (f32, residual)
                  + tq * d_pad * esz      # q
                  + tk * d_pad * esz      # k
                  + tk * c_pad * esz      # v
                  + tq * c_pad * 4)       # out (f32)
    scratch = tq * c_pad * 4 + 2 * tq * 4
    interm = 2 * tq * tk * 4              # s / p live values
    return in_out + scratch + interm


def _proj_vmem_bytes(tp, c_pad, d_pad, d_tot, esz):
    return (2 * tp * c_pad * 4                         # x tiles
            + 2 * c_pad * d_tot * esz                  # fused weights
            + 2 * d_tot * 4                            # bias
            + 2 * tp * (2 * d_pad + c_pad) * esz       # q/k/v outputs
            + tp * d_tot * 4)                          # f32 GEMM intermediate


def _choose_tiles(hw, c_pad, d_pad, esz, budget, max_tq, max_tk):
    """Largest (tq, tk) (tq-priority) dividing hw that fits the VMEM budget."""
    tq_prefs = [t for t in (1024, 512, 256, 128, 64, 32, 16, 8) if t <= max_tq]
    tk_prefs = [t for t in (512, 256, 128, 64, 32, 16, 8) if t <= max_tk]
    tq_cands = [t for t in tq_prefs if t <= hw and hw % t == 0] or [hw]
    tk_cands = [t for t in tk_prefs if t <= hw and hw % t == 0] or [hw]
    for tq in tq_cands:
        for tk in tk_cands:
            if _flash_vmem_bytes(tq, tk, c_pad, d_pad, esz) <= budget:
                return tq, tk
    return tq_cands[-1], tk_cands[-1]


def _choose_proj_tile(hw, c_pad, d_pad, d_tot, esz, budget):
    cands = [t for t in (512, 256, 128, 64, 32, 16, 8)
             if t <= hw and hw % t == 0] or [hw]
    for tp in cands:
        if _proj_vmem_bytes(tp, c_pad, d_pad, d_tot, esz) <= budget:
            return tp
    return cands[-1]


# --------------------------------------------------------------------------- #
# Stage 1: fused Q/K/V projection (single pass over x, computed exactly once). #
# --------------------------------------------------------------------------- #
def _qkv_projection_kernel(x_ref,          # VMEM (1, tp, Cp) f32
                           w_ref,          # VMEM (Cp, 2*Dp+Cp) compute_dtype
                           b_ref,          # VMEM (1, 2*Dp+Cp) f32
                           q_ref,          # VMEM (1, tp, Dp) compute_dtype
                           k_ref,          # VMEM (1, tp, Dp) compute_dtype
                           v_ref,          # VMEM (1, tp, Cp) compute_dtype
                           *, d_pad, compute_dtype):
    x = x_ref[0].astype(compute_dtype)
    y = jnp.dot(x, w_ref[...], preferred_element_type=jnp.float32) + b_ref[...]
    y = y.astype(compute_dtype)
    # All slice boundaries are multiples of 128 lanes -> no relayout copies.
    q_ref[0] = y[:, :d_pad]
    k_ref[0] = y[:, d_pad:2 * d_pad]
    v_ref[0] = y[:, 2 * d_pad:]


# --------------------------------------------------------------------------- #
# Stage 2: flash-style attention + residual (online softmax over kv tiles).    #
# --------------------------------------------------------------------------- #
def _flash_attention_kernel(gamma_ref,     # SMEM (1, 1) f32
                            x_ref,         # VMEM (1, tq, Cp) f32   (residual)
                            q_ref,         # VMEM (1, tq, Dp) compute_dtype
                            k_ref,         # VMEM (1, tk, Dp) compute_dtype
                            v_ref,         # VMEM (1, tk, Cp) compute_dtype
                            o_ref,         # VMEM (1, tq, Cp) f32
                            m_sc, l_sc,    # VMEM (tq, 1) f32
                            acc_sc,        # VMEM (tq, Cp) f32
                            *, kv_len, kv_len_padded, block_k,
                            use_bf16_exp, approx_recip):
    kv = pl.program_id(2)
    n_kv = pl.num_programs(2)

    @pl.when(kv == 0)
    def _init():
        m_sc[...] = jnp.full_like(m_sc, -jnp.inf)
        l_sc[...] = jnp.zeros_like(l_sc)
        acc_sc[...] = jnp.zeros_like(acc_sc)

    q = q_ref[0]                                            # (tq, Dp)
    k = k_ref[0]                                            # (tk, Dp)
    v = v_ref[0]                                            # (tk, Cp)

    # energy tile: contract channel dims directly (no k.T relayout).
    s = jax.lax.dot_general(q, k, (((1,), (1,)), ((), ())),
                            preferred_element_type=jnp.float32)   # (tq, tk)

    if kv_len < kv_len_padded:   # static: only emitted when HW needed padding
        col = kv * block_k + jax.lax.broadcasted_iota(jnp.int32, s.shape, 1)
        s = jnp.where(col < kv_len, s, jnp.float32(-1e30))

    # ---- online softmax (f32 statistics) ----
    m_prev = m_sc[...]
    m_new = jnp.maximum(m_prev, jnp.max(s, axis=-1, keepdims=True))
    alpha = jnp.exp(m_prev - m_new)
    if use_bf16_exp:
        # bf16 exp halves EUP cost on v6e/v7x; m/l stay in f32.
        p = jnp.exp((s - m_new).astype(jnp.bfloat16))
    else:
        p = jnp.exp(s - m_new)
    l_sc[...] = alpha * l_sc[...] + jnp.sum(p.astype(jnp.float32),
                                            axis=-1, keepdims=True)
    acc_sc[...] = alpha * acc_sc[...] + jnp.dot(
        p.astype(v.dtype), v, preferred_element_type=jnp.float32)
    m_sc[...] = m_new

    # ---- finalize: deferred normalization + residual ----
    @pl.when(kv == n_kv - 1)
    def _finalize():
        gamma = gamma_ref[0, 0]
        inv_l = pl.reciprocal(l_sc[...], approx=approx_recip)
        o_ref[0] = (gamma * (acc_sc[...] * inv_l) + x_ref[0]).astype(o_ref.dtype)


def attention_block(x_nchw, params, *, compute_dtype=jnp.bfloat16,
                    max_tq=1024, max_tk=512, use_bf16_exp=None,
                    vmem_budget_bytes=28 * 1024 * 1024):
    """x_nchw: (B, C, H, W) float32. params: 1x1 conv weights/biases + gamma."""
    B, C, H, W = x_nchw.shape
    assert C % 8 == 0, "AttentionBlock requires in_channels divisible by 8"
    HW = H * W
    C8 = C // 8

    c_pad = _round_up(max(C, LANE), LANE)       # padded channel dim (lane-dense)
    d_pad = _round_up(max(C8, LANE), LANE)      # padded q/k dim (lane-dense)
    d_tot = 2 * d_pad + c_pad
    hw_pad = _round_up(HW, 8)                   # sublane-aligned sequence length

    esz = jnp.dtype(compute_dtype).itemsize
    if use_bf16_exp is None:
        use_bf16_exp = jnp.dtype(compute_dtype) == jnp.dtype(jnp.bfloat16)

    tq, tk = _choose_tiles(hw_pad, c_pad, d_pad, esz, vmem_budget_bytes,
                           max_tq, max_tk)
    nq, nk = hw_pad // tq, hw_pad // tk
    tp = _choose_proj_tile(hw_pad, c_pad, d_pad, d_tot, esz, vmem_budget_bytes)
    n_p = hw_pad // tp

    # --- layout glue (pure JAX): NCHW -> (B, HW_pad, Cp), zero padded ---------
    x = jnp.transpose(x_nchw.reshape(B, C, HW), (0, 2, 1)).astype(jnp.float32)
    x = jnp.pad(x, ((0, 0), (0, hw_pad - HW), (0, c_pad - C)))

    def pad2(w, rows, cols):
        return jnp.zeros((rows, cols), jnp.float32).at[:w.shape[0], :w.shape[1]].set(w)

    # Conv2d 1x1 weights (Cout, Cin, 1, 1) -> matmul weights (Cin, Cout), padded.
    wq = params["wq"][:, :, 0, 0].T.astype(jnp.float32)        # (C, C8)
    wk = params["wk"][:, :, 0, 0].T.astype(jnp.float32)        # (C, C8)
    wv = params["wv"][:, :, 0, 0].T.astype(jnp.float32)        # (C, C)
    w_qkv = jnp.concatenate([pad2(wq, c_pad, d_pad),
                             pad2(wk, c_pad, d_pad),
                             pad2(wv, c_pad, c_pad)], axis=1).astype(compute_dtype)
    b_qkv = (jnp.zeros((1, d_tot), jnp.float32)
             .at[0, :C8].set(params["bq"])
             .at[0, d_pad:d_pad + C8].set(params["bk"])
             .at[0, 2 * d_pad:2 * d_pad + C].set(params["bv"]))
    gamma = params["gamma"].reshape(1, 1).astype(jnp.float32)

    # ---------------- stage 1: fused Q/K/V projection (once) -----------------
    proj_kernel = functools.partial(_qkv_projection_kernel,
                                    d_pad=d_pad, compute_dtype=compute_dtype)
    q, k, v = pl.pallas_call(
        proj_kernel,
        out_shape=(jax.ShapeDtypeStruct((B, hw_pad, d_pad), compute_dtype),
                   jax.ShapeDtypeStruct((B, hw_pad, d_pad), compute_dtype),
                   jax.ShapeDtypeStruct((B, hw_pad, c_pad), compute_dtype)),
        grid_spec=pltpu.PrefetchScalarGridSpec(
            num_scalar_prefetch=0,
            grid=(B, n_p),
            in_specs=[
                pl.BlockSpec((1, tp, c_pad), lambda b, i: (b, i, 0)),      # x
                pl.BlockSpec((c_pad, d_tot), lambda b, i: (0, 0)),         # W_qkv
                pl.BlockSpec((1, d_tot), lambda b, i: (0, 0)),             # b_qkv
            ],
            out_specs=[
                pl.BlockSpec((1, tp, d_pad), lambda b, i: (b, i, 0)),      # q
                pl.BlockSpec((1, tp, d_pad), lambda b, i: (b, i, 0)),      # k
                pl.BlockSpec((1, tp, c_pad), lambda b, i: (b, i, 0)),      # v
            ],
        ),
        compiler_params=pltpu.CompilerParams(
            dimension_semantics=("parallel", "parallel"),
            vmem_limit_bytes=40 * 1024 * 1024),
        cost_estimate=pl.CostEstimate(
            flops=int(2 * B * hw_pad * c_pad * d_tot),
            transcendentals=0,
            bytes_accessed=int(B * hw_pad * (c_pad * 4 + d_tot * esz)
                               + c_pad * d_tot * esz)),
    )(x, w_qkv, b_qkv)

    # ---------------- stage 2: flash attention + residual --------------------
    flash_kernel = functools.partial(
        _flash_attention_kernel,
        kv_len=HW, kv_len_padded=hw_pad, block_k=tk,
        use_bf16_exp=bool(use_bf16_exp),
        approx_recip=(jnp.dtype(compute_dtype) != jnp.dtype(jnp.float32)))

    flops = int(B * (2 * hw_pad * hw_pad * d_pad + 2 * hw_pad * hw_pad * c_pad))
    transcendentals = int(B * hw_pad * hw_pad)
    bytes_accessed = int(B * (hw_pad * c_pad * 4                 # x (residual)
                              + hw_pad * d_pad * esz             # q
                              + nq * hw_pad * (d_pad + c_pad) * esz  # k/v re-reads
                              + hw_pad * c_pad * 4))             # out

    out = pl.pallas_call(
        flash_kernel,
        out_shape=jax.ShapeDtypeStruct((B, hw_pad, c_pad), jnp.float32),
        grid_spec=pltpu.PrefetchScalarGridSpec(
            num_scalar_prefetch=0,
            grid=(B, nq, nk),
            in_specs=[
                pl.BlockSpec(memory_space=pltpu.SMEM),                        # gamma
                pl.BlockSpec((1, tq, c_pad), lambda b, qi, ki: (b, qi, 0)),   # x
                pl.BlockSpec((1, tq, d_pad), lambda b, qi, ki: (b, qi, 0)),   # q
                pl.BlockSpec((1, tk, d_pad), lambda b, qi, ki: (b, ki, 0)),   # k
                pl.BlockSpec((1, tk, c_pad), lambda b, qi, ki: (b, ki, 0)),   # v
            ],
            out_specs=pl.BlockSpec((1, tq, c_pad), lambda b, qi, ki: (b, qi, 0)),
            scratch_shapes=[
                pltpu.VMEM((tq, 1), jnp.float32),      # running max
                pltpu.VMEM((tq, 1), jnp.float32),      # running denom
                pltpu.VMEM((tq, c_pad), jnp.float32),  # output accumulator
            ],
        ),
        compiler_params=pltpu.CompilerParams(
            dimension_semantics=("parallel", "parallel", "arbitrary"),
            vmem_limit_bytes=40 * 1024 * 1024),
        cost_estimate=pl.CostEstimate(flops=flops,
                                      transcendentals=transcendentals,
                                      bytes_accessed=bytes_accessed),
    )(gamma, x, q, k, v)

    # (B, HW_pad, Cp) -> slice padding -> NCHW
    out = out[:, :HW, :C]
    return jnp.transpose(out, (0, 2, 1)).reshape(B, C, H, W)


def attention_block_ref(x_nchw, params):
    """Pure-JAX reference mirroring the PyTorch forward exactly."""
    B, C, H, W = x_nchw.shape
    HW = H * W
    x = x_nchw.astype(jnp.float32)

    def conv1x1(x, w, b):
        y = jnp.einsum("bchw,oc->bohw", x, w[:, :, 0, 0])
        return y + b[None, :, None, None]

    q = conv1x1(x, params["wq"], params["bq"]).reshape(B, -1, HW)     # (B, C8, HW)
    k = conv1x1(x, params["wk"], params["bk"]).reshape(B, -1, HW)     # (B, C8, HW)
    v = conv1x1(x, params["wv"], params["bv"]).reshape(B, -1, HW)     # (B, C,  HW)
    q = jnp.transpose(q, (0, 2, 1))                                   # (B, HW, C8)
    energy = jnp.einsum("bik,bkj->bij", q, k)                         # (B, HW, HW)
    attn = jax.nn.softmax(energy, axis=-1)
    out = jnp.einsum("bcj,bij->bci", v, attn)                         # (B, C, HW)
    out = out.reshape(B, C, H, W)
    return params["gamma"][0] * out + x


if __name__ == "__main__":
    def make_params(key, C):
        C8 = C // 8
        k1, k2, k3, k4, k5, k6 = jax.random.split(key, 6)
        return {
            "wq": 0.1 * jax.random.normal(k1, (C8, C, 1, 1), dtype=jnp.float32),
            "bq": 0.1 * jax.random.normal(k2, (C8,), dtype=jnp.float32),
            "wk": 0.1 * jax.random.normal(k3, (C8, C, 1, 1), dtype=jnp.float32),
            "bk": 0.1 * jax.random.normal(k4, (C8,), dtype=jnp.float32),
            "wv": 0.1 * jax.random.normal(k5, (C, C, 1, 1), dtype=jnp.float32),
            "bv": 0.1 * jax.random.normal(k6, (C,), dtype=jnp.float32),
            # PyTorch inits gamma to 0 (out == x trivially); use a non-zero value
            # so the attention path is actually exercised.
            "gamma": jnp.array([0.5], dtype=jnp.float32),
        }

    root = jax.random.PRNGKey(0)
    kx1, kp1, kx2, kp2 = jax.random.split(root, 4)

    # --- Cases 1 & 2: B=2, C=32, H=W=16 (HW=256) ------------------------------
    B, C, H, W = 2, 32, 16, 16
    x1 = jax.random.normal(kx1, (B, C, H, W), dtype=jnp.float32)
    p1 = make_params(kp1, C)
    y_ref1 = attention_block_ref(x1, p1)

    # f32 operands, forced multi-tile grid: tight check of the online-softmax /
    # two-stage structure (exact reciprocal, f32 exp).
    y_f32 = jax.block_until_ready(
        attention_block(x1, p1, compute_dtype=jnp.float32, max_tq=128, max_tk=64))
    assert y_f32.shape == (B, C, H, W)
    assert jnp.allclose(y_f32, y_ref1, atol=2e-3, rtol=2e-3), (
        float(jnp.max(jnp.abs(y_f32 - y_ref1))))

    # bf16 MXU operands, default large-tile config (production path).
    y_bf16 = jax.block_until_ready(attention_block(x1, p1))
    assert y_bf16.shape == (B, C, H, W)
    assert jnp.allclose(y_bf16, y_ref1, atol=5e-2, rtol=5e-2), (
        float(jnp.max(jnp.abs(y_bf16 - y_ref1))))

    # --- Case 3: HW=25 (not a multiple of 8) -> exercises key-column masking --
    B3, C3, H3, W3 = 1, 16, 5, 5
    x3 = jax.random.normal(kx2, (B3, C3, H3, W3), dtype=jnp.float32)
    p3 = make_params(kp2, C3)
    y_ref3 = attention_block_ref(x3, p3)
    y3 = jax.block_until_ready(attention_block(x3, p3, max_tq=16, max_tk=8))
    assert y3.shape == (B3, C3, H3, W3)
    assert jnp.allclose(y3, y_ref3, atol=5e-2, rtol=5e-2), (
        float(jnp.max(jnp.abs(y3 - y_ref3))))

    print("KERNEL_OK")
</pallas_src>

<mosaic_0001>
module attributes {stable_mosaic.version = 11 : i64} {
  func.func @_qkv_projection_kernel(%arg0: i32, %arg1: i32, %arg2: memref<1x256x128xf32, #tpu.memory_space<vmem>>, %arg3: memref<128x384xf32, #tpu.memory_space<vmem>>, %arg4: memref<1x384xf32, #tpu.memory_space<vmem>>, %arg5: memref<1x256x128xf32, #tpu.memory_space<vmem>>, %arg6: memref<1x256x128xf32, #tpu.memory_space<vmem>>, %arg7: memref<1x256x128xf32, #tpu.memory_space<vmem>>) attributes {dimension_semantics = [#tpu.dimension_semantics<parallel>, #tpu.dimension_semantics<parallel>], iteration_bounds = array<i64: 2, 1>, scalar_prefetch = 0 : i64, scratch_operands = 0 : i64, tpu.core_type = #tpu.core_type<tc>, window_params = [{transform_indices = @transform_0, window_bounds = array<i64: 1, 256, 128>}, {pipeline_mode = #tpu.pipeline_mode<synchronous>, transform_indices = @transform_1, window_bounds = array<i64: 128, 384>}, {pipeline_mode = #tpu.pipeline_mode<synchronous>, transform_indices = @transform_2, window_bounds = array<i64: 1, 384>}, {transform_indices = @transform_3, window_bounds = array<i64: 1, 256, 128>}, {transform_indices = @transform_4, window_bounds = array<i64: 1, 256, 128>}, {transform_indices = @transform_5, window_bounds = array<i64: 1, 256, 128>}]} {
    %c0 = arith.constant 0 : index
    %c0_0 = arith.constant 0 : index
    %c0_1 = arith.constant 0 : index
    %0 = vector.load %arg2[%c0, %c0_0, %c0_1] : memref<1x256x128xf32, #tpu.memory_space<vmem>>, vector<1x256x128xf32>
    %1 = vector.shape_cast %0 : vector<1x256x128xf32> to vector<256x128xf32>
    %c0_2 = arith.constant 0 : index
    %c0_3 = arith.constant 0 : index
    %2 = vector.load %arg3[%c0_2, %c0_3] : memref<128x384xf32, #tpu.memory_space<vmem>>, vector<128x384xf32>
    %cst = arith.constant dense<0.000000e+00> : vector<256x384xf32>
    %3 = tpu.matmul %1, %2, %cst {dimension_numbers = #tpu.dot_dimension_numbers<[1], [0], [0], [1], [0, 0, 1, 1], [], []>} : vector<256x128xf32>, vector<128x384xf32>, vector<256x384xf32> -> vector<256x384xf32>
    %c0_4 = arith.constant 0 : index
    %c0_5 = arith.constant 0 : index
    %4 = vector.load %arg4[%c0_4, %c0_5] : memref<1x384xf32, #tpu.memory_space<vmem>>, vector<1x384xf32>
    %5 = vector.broadcast %4 : vector<1x384xf32> to vector<256x384xf32>
    %6 = arith.addf %3, %5 : vector<256x384xf32>
    %7 = vector.extract_strided_slice %6 {offsets = [0, 0], sizes = [256, 128], strides = [1, 1]} : vector<256x384xf32> to vector<256x128xf32>
    %c0_6 = arith.constant 0 : index
    %c0_7 = arith.constant 0 : index
    %c0_8 = arith.constant 0 : index
    %8 = vector.load %arg5[%c0_6, %c0_7, %c0_8] : memref<1x256x128xf32, #tpu.memory_space<vmem>>, vector<1x256x128xf32>
    %9 = vector.shape_cast %8 : vector<1x256x128xf32> to vector<256x128xf32>
    %10 = vector.shape_cast %7 : vector<256x128xf32> to vector<1x256x128xf32>
    tpu.vector_store %arg5[%c0_6, %c0_7, %c0_8], %10 {strides = array<i32>} : memref<1x256x128xf32, #tpu.memory_space<vmem>>, vector<1x256x128xf32>,
    %11 = vector.extract_strided_slice %6 {offsets = [0, 128], sizes = [256, 128], strides = [1, 1]} : vector<256x384xf32> to vector<256x128xf32>
    %c0_9 = arith.constant 0 : index
    %c0_10 = arith.constant 0 : index
    %c0_11 = arith.constant 0 : index
    %12 = vector.load %arg6[%c0_9, %c0_10, %c0_11] : memref<1x256x128xf32, #tpu.memory_space<vmem>>, vector<1x256x128xf32>
    %13 = vector.shape_cast %12 : vector<1x256x128xf32> to vector<256x128xf32>
    %14 = vector.shape_cast %11 : vector<256x128xf32> to vector<1x256x128xf32>
    tpu.vector_store %arg6[%c0_9, %c0_10, %c0_11], %14 {strides = array<i32>} : memref<1x256x128xf32, #tpu.memory_space<vmem>>, vector<1x256x128xf32>,
    %15 = vector.extract_strided_slice %6 {offsets = [0, 256], sizes = [256, 128], strides = [1, 1]} : vector<256x384xf32> to vector<256x128xf32>
    %c0_12 = arith.constant 0 : index
    %c0_13 = arith.constant 0 : index
    %c0_14 = arith.constant 0 : index
    %16 = vector.load %arg7[%c0_12, %c0_13, %c0_14] : memref<1x256x128xf32, #tpu.memory_space<vmem>>, vector<1x256x128xf32>
    %17 = vector.shape_cast %16 : vector<1x256x128xf32> to vector<256x128xf32>
    %18 = vector.shape_cast %15 : vector<256x128xf32> to vector<1x256x128xf32>
    tpu.vector_store %arg7[%c0_12, %c0_13, %c0_14], %18 {strides = array<i32>} : memref<1x256x128xf32, #tpu.memory_space<vmem>>, vector<1x256x128xf32>,
    return
  }
  func.func @transform_0(%arg0: i32, %arg1: i32) -> (i32, i32, i32) {
    %c0_i32 = arith.constant 0 : i32
    %c0_i32_0 = arith.constant 0 : i32
    return %arg0, %arg1, %c0_i32 : i32, i32, i32
  }
  func.func @transform_1(%arg0: i32, %arg1: i32) -> (i32, i32) {
    %c0_i32 = arith.constant 0 : i32
    %c0_i32_0 = arith.constant 0 : i32
    %c0_i32_1 = arith.constant 0 : i32
    return %c0_i32, %c0_i32_0 : i32, i32
  }
  func.func @transform_2(%arg0: i32, %arg1: i32) -> (i32, i32) {
    %c0_i32 = arith.constant 0 : i32
    %c0_i32_0 = arith.constant 0 : i32
    %c0_i32_1 = arith.constant 0 : i32
    return %c0_i32, %c0_i32_0 : i32, i32
  }
  func.func @transform_3(%arg0: i32, %arg1: i32) -> (i32, i32, i32) {
    %c0_i32 = arith.constant 0 : i32
    %c0_i32_0 = arith.constant 0 : i32
    return %arg0, %arg1, %c0_i32 : i32, i32, i32
  }
  func.func @transform_4(%arg0: i32, %arg1: i32) -> (i32, i32, i32) {
    %c0_i32 = arith.constant 0 : i32
    %c0_i32_0 = arith.constant 0 : i32
    return %arg0, %arg1, %c0_i32 : i32, i32, i32
  }
  func.func @transform_5(%arg0: i32, %arg1: i32) -> (i32, i32, i32) {
    %c0_i32 = arith.constant 0 : i32
    %c0_i32_0 = arith.constant 0 : i32
    return %arg0, %arg1, %c0_i32 : i32, i32, i32
  }
}

</mosaic_0001>

<bundles_post_ra>
// kernel: tpu_custom_call.1
= control target key start
LH: loop header
LB: loop body
LE: loop exit
PB: predicated region body
PF: predicated region fallthrough
CT: control target
= control target key end

     0   :  { %s2311_s0 = inlined_call_operand.hbm [shape: f32[2,256,128], index: 0, kind: input, shape index: {}]   ;;  %s2312_s1 = inlined_call_operand.hbm [shape: f32[128,384], index: 1, kind: input, shape index: {}]   ;;  %s2313_s2 = inlined_call_operand.vmem [shape: f32[1,384], index: 2, kind: input, shape index: {}]   ;;  %s2314_s3 = inlined_call_operand.hbm [shape: f32[2,256,128], index: 3, kind: output, shape index: {0}]   ;;  %s2315_s4 = inlined_call_operand.hbm [shape: f32[2,256,128], index: 4, kind: output, shape index: {1}]   ;;  %s2316_s5 = inlined_call_operand.hbm [shape: f32[2,256,128], index: 5, kind: output, shape index: {2}]  }
   0x1   :  { %2320 = sst [smem:[#allocation16_spill]] %s2311_s0 }
   0x2   :  { %2321 = sst [smem:[#allocation17_spill]] %s2312_s1 }
   0x3   :  { %11 = vsyncpa [#allocation3], 0 }
   0x4   :  { %13 = vsyncpa [#allocation3 + $0x1], 0 }
   0x5   :  { %14 = vsyncpa [#allocation6], 0 }
   0x6   :  { %15 = vsyncpa [#allocation4], 0 }
   0x7   :  { %17 = vsyncpa [#allocation4 + $0x1], 0 }
   0x8   :  { %18 = vsyncpa [#allocation9], 0 }
   0x9   :  { %20 = vsyncpa [#allocation9 + $0x1], 0  ;;  %s1720_s18 = smov 0   ;;  %s1722_s19 = smov 0  }
   0xa   :  { %s1724_s20 = smov 0   ;;  %s1726_s21 = smov 0  }
   0xb   :  { %s1728_s22 = smov 0   ;;  %s1730_s23 = smov 0  }
   0xc LB: > { %s1751_s24 = sadd.s32 4294967295, %s1676_s23   ;;  %s2317_s25 = sadd.s32 4294967294, %s1676_s23   ;;  %s1676_s23 = sphi %s1730_s23, %s26_s23   ;;  %s1672_s22 = sphi %s1728_s22, %s2345_s22   ;;  %s1668_s21 = sphi %s1726_s21, %s2344_s21   ;;  %s1664_s20 = sphi %s1724_s20, %s2343_s20   ;;  %s1660_s19 = sphi %s1722_s19, %s2342_s19   ;;  %s1656_s18 = sphi %s1720_s18, %s2341_s18  }
   0xd   : > { %p60_p0 = scmp.ne.s32.totalorder %s1660_s19, %s1656_s18  ;;  %p2319_p1 = scmp.eq.s32.totalorder %s1751_s24, 0 }
   0xe   : > { %p134_p3 = scmp.eq.s32.totalorder %s2317_s25, 1  ;;  %p1205_p5 = scmp.ge.s32.totalorder %s1676_s23, 1 }
   0xf   : > { %p1762_p4 = por %p2319_p1, %p60_p0  ;;  %p197_p7 = scmp.lt.s32.totalorder %s1676_s23, 3 }
  0x10   : > { %p1767_p6 = por %p134_p3, %p60_p0  ;;  %s1678_s29 = smov [#allocation5]  }
  0x11   : > { %p1772_p8 = pnand %p1205_p5, %p197_p7  ;;  %s209_s30 = sshll.u32 %s1678_s29, 4  ;;  %s210_s30 = int_to_ptr.vmem [resolvable:$true] %s209_s30 }
  0x12   : > { %s2323_s27 = scalar_select %p1767_p6, 1, 0 }
  0x13   : > { %p1404_p9 = pneg %p1772_p8  ;;  %s38_s7 = sadd.s32 1, %s1672_s22 }
  0x14   : > { %s1493_s8 = scalar_lea.vmem %s210_s30, 6144  ;;  %p1501_p5 = scmp.lt.s32.totalorder %s210_s30, %s210_s30 }
  0x15   : > { %p1781_p11 = pnand %p1404_p9, %p2319_p1  ;;  %p1494_p13 = scmp.ne.s32.totalorder %s210_s30, %s1493_s8 }
  0x16   : > { %p1502_p7 = scmp.lt.s32.totalorder %s1493_s8, %s1493_s8 }
  0x17   : > { %p1484_p12 = pneg %p1781_p11 }
  0x18   : > { %p1503_p2 = por %p1502_p7, %p1501_p5 }
  0x19   : > { %p1496_p0 = pnand %p1494_p13, %p1484_p12 }
  0x1b   : > { %p1497_p3 = pneg %p1496_p0 }
  0x1d   : > { %p1504_p6 = pnand %p1503_p2, %p1497_p3 }
  0x1f   : > { %1507 = shalt.err (!%p1504_p6)
}
  0x20   : > { %s1679_s9 = smov 384   ;;  %s1680_s10 = smov 24  }
  0x21   : > { %s2326_s1 = sld [smem:[#allocation17_spill]]  ;;  %p40_p2 = scmp.ge.s32.totalorder %s38_s7, 2 }
  0x22   : > { %s47_s13 = sadd.s32 1, %s1664_s20  ;;  %p54_p6 = scmp.ne.s32.totalorder %s1664_s20, %s1660_s19 }
  0x23   : > { %p55_p9 = scmp.eq.s32.totalorder %s1676_s23, 0  ;;  %s2347_s7 = smov (%p40_p2, %s38_s7), 0 }
  0x24   : > { %2327 = sst [smem:[#allocation15_spill]] %s2347_s7  ;;  %p2329_p13 = scmp.eq.s32.totalorder %s1751_s24, 1 }
  0x25   : > { %p1799_p12 = por %p55_p9, %p54_p6  ;;  %s42_s16 = ssub.s32 %s1672_s22, %s2347_s7 }
  0x26   : > { %p1805_p0 = por %p2329_p13, %p54_p6  ;;  %p1423_p3 = scmp.lt.s32.totalorder %s1676_s23, 2 }
  0x27   : > { %1407 = dma.hbm_to_vmem [thread:$0]  (!%p1781_p11), %s2326_s1, 6144, %s210_s30, [#allocation6], %s1679_s9, %s1679_s9, %s1680_s10  }
  0x28   : > { %p45_p11 = scmp.eq.s32.totalorder %s42_s16, 0  ;;  %s226_s17 = sand.u32 1, %s1664_s20  }
  0x29   : > { %s1208_s29 = sshll.u32 %s226_s17, 8  ;;  %s1228_s6 = sshll.u32 %s1672_s22, 12 }
  0x2a   : > { %s1814_s30 = scalar_select %p45_p11, %s1664_s20, %s47_s13  }
  0x2b   : > { %s2331_s0 = sld [smem:[#allocation16_spill]]  ;;  %s230_s11 = scalar_lea.vmem [#allocation2], %s1208_s29 }
  0x2c   : > { %s239_s12 = sshll.u32 %s230_s11, 4  ;;  %p1822_p5 = pnand %p1423_p3, %p1799_p12  ;;  %s240_s12 = int_to_ptr.vmem [resolvable:$true] %s239_s12 }
  0x2d   : > { %s227_s1 = scalar_lea.sflag [#allocation3], %s226_s17  ;;  %s1521_s16 = scalar_lea.vmem %s240_s12, 4096 }
  0x2e   : > { %p1510_p7 = pneg %p1822_p5  ;;  %p1522_p2 = scmp.ne.s32.totalorder %s240_s12, %s1521_s16 }
  0x2f   : > { %s1681_s13 = smov [#allocation2]  }
  0x30   : > { %p1524_p6 = pnand %p1522_p2, %p1510_p7  ;;  %s1526_s7 = sshll.u32 %s1681_s13, 4  ;;  %s1527_s7 = int_to_ptr.vmem [resolvable:$false] %s1526_s7 }
  0x31   : > { %s238_s10 = scalar_lea.hbm %s2331_s0, %s1228_s6  ;;  %s1528_s6 = scalar_lea.vmem %s1527_s7, 8192 }
  0x32   : > { %p1525_p9 = pneg %p1524_p6  ;;  %p1529_p13 = scmp.lt.s32.totalorder %s240_s12, %s1527_s7 }
  0x33   : > { %p1530_p11 = scmp.lt.s32.totalorder %s1528_s6, %s1521_s16 }
  0x35   : > { %p1531_p10 = por %p1530_p11, %p1529_p13 }
  0x37   : > { %p1532_p1 = pnand %p1531_p10, %p1525_p9 }
  0x39   : > { %1535 = shalt.err (!%p1532_p1)
}
  0x3a   : > { %s1682_s14 = smov 128   ;;  %s1683_s29 = smov 8  }
  0x3b   : > { %1411 = dma.hbm_to_vmem [thread:$0]  (!%p1822_p5), %s238_s10, 4096, %s240_s12, %s227_s1, %s1682_s14, %s1682_s14, %s1683_s29  }
  0x3c   : > { %251 = sbr.rel (%p1772_p8) target bundleno = 454 (0x1c6), region = 32  ;;  %s1833_s17 = sand.u32 (!%p1772_p8), 1, %s1660_s19  }
  0x3d   : > { %s1836_s8 = sshll.u32 (!%p1772_p8), %s1833_s17, 8  ;;  %s254_s7 = scalar_lea.sflag (!%p1772_p8), [#allocation3], %s1833_s17 }
  0x3e   : > { %s1840_s9 = scalar_lea.vmem (!%p1772_p8), [#allocation2], %s1836_s8 }
  0x41   : > { %1639 = dma.done.wait (%p1762_p4), %s254_s7, 4096  }
  0x42   : > { %1641 = vsyncadd (%p1762_p4), %s254_s7, 4294963200  ;;  %p2333_p1 = scmp.eq.s32.totalorder %s1751_s24, 0 }
  0x44   : > { %1643 = dma.done.wait (%p2333_p1), [#allocation6], 6144   ;;  %p2334_p8 = pmov %p2333_p1 }
  0x45   : > { %v1684_v0 = vmov 0.0   ;;  %v380_v1 = vld [vmem:[#allocation5 + $0x170] sm:$0xff]  ;;  %v379_v2 = vld [vmem:[#allocation5 + $0x168] sm:$0xff]  ;;  %v377_v3 = vld [vmem:[#allocation5 + $0x158] sm:$0xff]  ;;  %s1980_s26 = scalar_lea.vmem [#allocation7], %s1836_s8  ;;  %s1987_s28 = scalar_lea.vmem [#allocation8], %s1836_s8 }
  0x46   : > { %1645 = vsyncadd (%p2334_p8), [#allocation6], 4294961152  ;;  %463 = vmatprep.mubr.f32.mxu0 %v1684_v0  ;;  %607 = vmatprep.mubr.f32.mxu1 %v1684_v0  ;;  %v376_v4 = vld [vmem:[#allocation5 + $0x150] sm:$0xff]  ;;  %v374_v5 = vld [vmem:[#allocation5 + $0x140] sm:$0xff]  ;;  %s2056_s10 = scalar_lea.vmem [#allocation10], %s1836_s8  ;;  %s1229_s12 = sshll.u32 %s1668_s21, 12 }
  0x47   : > { %399 = vmatprep.subr.mxu0 %v380_v1  ;;  %1360 = vmatprep.subr.mxu1 %v380_v1  ;;  %v373_v6 = vld [vmem:[#allocation5 + $0x138] sm:$0xff]  ;;  %v371_v7 = vld [vmem:[#allocation5 + $0x128] sm:$0xff]  ;;  %v370_v8 = vld [vmem:[#allocation5 + $0x120] sm:$0xff]  ;;  %s1003_s16 = sshll.u32 %s1980_s26, 4  ;;  %s1021_s13 = sshll.u32 %s1987_s28, 4  ;;  %s2184_s16 = int_to_ptr.vmem [resolvable:$true] %s1003_s16  ;;  %s2200_s13 = int_to_ptr.vmem [resolvable:$true] %s1021_s13 }
  0x48   : > { %400 = vmatpush1.msra.mxu0 %v379_v2  ;;  %1376 = vmatpush1.msra.mxu1 %v379_v2  ;;  %v368_v9 = vld [vmem:[#allocation5 + $0x110] sm:$0xff]  ;;  %v367_v10 = vld [vmem:[#allocation5 + $0x108] sm:$0xff]  ;;  %v365_v11 = vld [vmem:[#allocation5 + $0xf8] sm:$0xff]  ;;  %s1039_s6 = sshll.u32 %s2056_s10, 4  ;;  %s2182_s29 = scalar_lea.hbm %s2314_s3, %s1229_s12  ;;  %s2202_s6 = int_to_ptr.vmem [resolvable:$true] %s1039_s6 }
  0x49   : > { %401 = vmatprep.subr.mxu0 %v377_v3  ;;  %1361 = vmatprep.subr.mxu1 %v377_v3  ;;  %v364_v12 = vld [vmem:[#allocation5 + $0xf0] sm:$0xff]  ;;  %v362_v13 = vld [vmem:[#allocation5 + $0xe0] sm:$0xff]  ;;  %v361_v14 = vld [vmem:[#allocation5 + $0xd8] sm:$0xff]  ;;  %s2196_s21 = scalar_lea.hbm %s2316_s5, %s1229_s12  ;;  %s1536_s8 = scalar_lea.vmem %s2184_s16, 4096 }
  0x4a   : > { %402 = vmatpush1.msra.mxu0 %v376_v4  ;;  %1377 = vmatpush1.msra.mxu1 %v376_v4  ;;  %v359_v15 = vld [vmem:[#allocation5 + $0xc8] sm:$0xff]  ;;  %v358_v16 = vld [vmem:[#allocation5 + $0xc0] sm:$0xff]  ;;  %v356_v17 = vld [vmem:[#allocation5 + $0xb0] sm:$0xff]  ;;  %p1537_p4 = scmp.ne.s32.totalorder %s2184_s16, %s1536_s8 }
  0x4b   : > { %403 = vmatprep.subr.mxu0 %v374_v5  ;;  %1362 = vmatprep.subr.mxu1 %v374_v5  ;;  %v355_v18 = vld [vmem:[#allocation5 + $0xa8] sm:$0xff]  ;;  %v353_v19 = vld [vmem:[#allocation5 + $0x98] sm:$0xff]  ;;  %v352_v20 = vld [vmem:[#allocation5 + $0x90] sm:$0xff] }
  0x4c   : > { %404 = vmatpush1.msra.mxu0 %v373_v6  ;;  %1378 = vmatpush1.msra.mxu1 %v373_v6  ;;  %v350_v21 = vld [vmem:[#allocation5 + $0x80] sm:$0xff]  ;;  %v349_v22 = vld [vmem:[#allocation5 + $0x78] sm:$0xff]  ;;  %v347_v23 = vld [vmem:[#allocation5 + $0x68] sm:$0xff]  ;;  %p1538_p10 = pnand %p1537_p4, %p1805_p0 }
  0x4d   : > { %405 = vmatprep.subr.mxu0 %v371_v7  ;;  %1363 = vmatprep.subr.mxu1 %v371_v7  ;;  %v346_v24 = vld [vmem:[#allocation5 + $0x60] sm:$0xff]  ;;  %v344_v25 = vld [vmem:[#allocation5 + $0x50] sm:$0xff]  ;;  %v343_v26 = vld [vmem:[#allocation5 + $0x48] sm:$0xff] }
  0x4e   : > { %406 = vmatpush1.msra.mxu0 %v370_v8  ;;  %1379 = vmatpush1.msra.mxu1 %v370_v8  ;;  %v341_v27 = vld [vmem:[#allocation5 + $0x38] sm:$0xff]  ;;  %v340_v28 = vld [vmem:[#allocation5 + $0x30] sm:$0xff]  ;;  %v338_v29 = vld [vmem:[#allocation5 + $0x20] sm:$0xff]  ;;  %p1539_p12 = pneg %p1538_p10 }
  0x4f   : > { %407 = vmatprep.subr.mxu0 %v368_v9  ;;  %1364 = vmatprep.subr.mxu1 %v368_v9  ;;  %v337_v30 = vld [vmem:[#allocation5 + $0x18] sm:$0xff]  ;;  %v335_v31 = vld [vmem:[#allocation5 + $0x8] sm:$0xff]  ;;  %v334_v32 = vld [vmem:[#allocation5] sm:$0xff] }
  0x50   : > { %408 = vmatpush1.msra.mxu0 %v367_v10  ;;  %1380 = vmatpush1.msra.mxu1 %v367_v10  ;;  %v1853_v33 = vld [vmem:[%s1840_s9] sm:$0xff]  ;;  %v381_v35 = vld [vmem:[#allocation5 + $0x178] sm:$0xff]  ;;  %v1862_v37 = vld [vmem:[%s1840_s9 + $0x8] sm:$0xff] }
  0x51   : > { %409 = vmatprep.subr.mxu0 %v365_v11  ;;  %1365 = vmatprep.subr.mxu1 %v365_v11  ;;  %v1856_v34 = vld [vmem:[%s1840_s9 + $0xc0] sm:$0xff]  ;;  %v1866_v38 = vld [vmem:[%s1840_s9 + $0xc8] sm:$0xff]  ;;  %v372_v40 = vld [vmem:[#allocation5 + $0x130] sm:$0xff] }
  0x52   : > { %410 = vmatpush1.msra.mxu0 %v364_v12  ;;  %1381 = vmatpush1.msra.mxu1 %v364_v12  ;;  %v378_v36 = vld [vmem:[#allocation5 + $0x160] sm:$0xff]  ;;  %v375_v39 = vld [vmem:[#allocation5 + $0x148] sm:$0xff]  ;;  %v1871_v41 = vld [vmem:[%s1840_s9 + $0x10] sm:$0xff] }
  0x53   : > { %411 = vmatprep.subr.mxu0 %v362_v13  ;;  %1366 = vmatprep.subr.mxu1 %v362_v13  ;;  %v1875_v42 = vld [vmem:[%s1840_s9 + $0xd0] sm:$0xff]  ;;  %v369_v43 = vld [vmem:[#allocation5 + $0x118] sm:$0xff]  ;;  %v366_v44 = vld [vmem:[#allocation5 + $0x100] sm:$0xff] }
  0x54   : > { %412 = vmatpush1.msra.mxu0 %v361_v14  ;;  %1382 = vmatpush1.msra.mxu1 %v361_v14  ;;  %v1881_v45 = vld [vmem:[%s1840_s9 + $0x18] sm:$0xff]  ;;  %v363_v47 = vld [vmem:[#allocation5 + $0xe8] sm:$0xff]  ;;  %v360_v48 = vld [vmem:[#allocation5 + $0xd0] sm:$0xff] }
  0x55   : > { %413 = vmatprep.subr.mxu0 %v359_v15  ;;  %1367 = vmatprep.subr.mxu1 %v359_v15  ;;  %v1885_v46 = vld [vmem:[%s1840_s9 + $0xd8] sm:$0xff]  ;;  %v306_v49 = vld [vmem:[%s1840_s9 + $0x20] sm:$0xff]  ;;  %v307_v53 = vld [vmem:[%s1840_s9 + $0x28] sm:$0xff] }
  0x56   : > { %414 = vmatpush1.msra.mxu0 %v358_v16  ;;  %1383 = vmatpush1.msra.mxu1 %v358_v16  ;;  %v1893_v50 = vld [vmem:[%s1840_s9 + $0xe0] sm:$0xff]  ;;  %v357_v51 = vld [vmem:[#allocation5 + $0xb8] sm:$0xff]  ;;  %v1900_v54 = vld [vmem:[%s1840_s9 + $0xe8] sm:$0xff] }
  0x57   : > { %415 = vmatprep.subr.mxu0 %v356_v17  ;;  %1368 = vmatprep.subr.mxu1 %v356_v17  ;;  %v354_v52 = vld [vmem:[#allocation5 + $0xa0] sm:$0xff]  ;;  %v351_v55 = vld [vmem:[#allocation5 + $0x88] sm:$0xff]  ;;  %v348_v56 = vld [vmem:[#allocation5 + $0x70] sm:$0xff] }
  0x58   : > { %416 = vmatpush1.msra.mxu0 %v355_v18  ;;  %1384 = vmatpush1.msra.mxu1 %v355_v18  ;;  %v308_v57 = vld [vmem:[%s1840_s9 + $0x30] sm:$0xff]  ;;  %v345_v59 = vld [vmem:[#allocation5 + $0x58] sm:$0xff]  ;;  %v342_v60 = vld [vmem:[#allocation5 + $0x40] sm:$0xff]  ;;  %v384_v18 = vlaneseq }
  0x59   : > { %417 = vmatprep.subr.mxu0 %v353_v19  ;;  %1369 = vmatprep.subr.mxu1 %v353_v19  ;;  %v1907_v58 = vld [vmem:[%s1840_s9 + $0xf0] sm:$0xff]  ;;  %v309_v61 = vld [vmem:[%s1840_s9 + $0x38] sm:$0xff]  ;;  %v339_v63 = vld [vmem:[#allocation5 + $0x28] sm:$0xff] }
  0x5a   : > { %418 = vmatpush1.msra.mxu0 %v352_v20  ;;  %1385 = vmatpush1.msra.mxu1 %v352_v20  ;;  %v1914_v62 = vld [vmem:[%s1840_s9 + $0xf8] sm:$0xff]  ;;  %v336_v1 = vld [vmem:[#allocation5 + $0x10] sm:$0xff]  ;;  %v310_v2 = vld [vmem:[%s1840_s9 + $0x40] sm:$0xff]  ;;  %v1962_v19 = vshrl.u32 %v384_v18, 7 }
  0x5b   : > { %419 = vmatprep.subr.mxu0 %v350_v21  ;;  %1370 = vmatprep.subr.mxu1 %v350_v21  ;;  %v311_v3 = vld [vmem:[%s1840_s9 + $0x48] sm:$0xff]  ;;  %v312_v4 = vld [vmem:[%s1840_s9 + $0x50] sm:$0xff]  ;;  %v313_v5 = vld [vmem:[%s1840_s9 + $0x58] sm:$0xff] }
  0x5c   : > { %420 = vmatpush1.msra.mxu0 %v349_v22  ;;  %1386 = vmatpush1.msra.mxu1 %v349_v22  ;;  %v314_v6 = vld [vmem:[%s1840_s9 + $0x60] sm:$0xff]  ;;  %v315_v7 = vld [vmem:[%s1840_s9 + $0x68] sm:$0xff]  ;;  %v316_v8 = vld [vmem:[%s1840_s9 + $0x70] sm:$0xff]  ;;  %v386_v20 = vsub.s32 0, %v1962_v19  ;;  %v390_v22 = vsub.s32 1, %v1962_v19 }
  0x5d   : > { %421 = vmatprep.subr.mxu0 %v347_v23  ;;  %1371 = vmatprep.subr.mxu1 %v347_v23  ;;  %v317_v9 = vld [vmem:[%s1840_s9 + $0x78] sm:$0xff]  ;;  %v318_v10 = vld [vmem:[%s1840_s9 + $0x80] sm:$0xff]  ;;  %v319_v11 = vld [vmem:[%s1840_s9 + $0x88] sm:$0xff] }
  0x5e   : > { %422 = vmatpush1.msra.mxu0 %v346_v24  ;;  %1387 = vmatpush1.msra.mxu1 %v346_v24  ;;  %v320_v12 = vld [vmem:[%s1840_s9 + $0x90] sm:$0xff]  ;;  %v321_v13 = vld [vmem:[%s1840_s9 + $0x98] sm:$0xff]  ;;  %v322_v14 = vld [vmem:[%s1840_s9 + $0xa0] sm:$0xff] }
  0x5f   : > { %423 = vmatprep.subr.mxu0 %v344_v25  ;;  %1372 = vmatprep.subr.mxu1 %v344_v25  ;;  %v323_v15 = vld [vmem:[%s1840_s9 + $0xa8] sm:$0xff]  ;;  %v324_v16 = vld [vmem:[%s1840_s9 + $0xb0] sm:$0xff]  ;;  %v325_v17 = vld [vmem:[%s1840_s9 + $0xb8] sm:$0xff]  ;;  %s2191_s9 = scalar_lea.hbm %s2315_s4, %s1229_s12  ;;  %s1685_s12 = smov [#allocation7]  }
  0x60   : > { %424 = vmatpush1.msra.mxu0 %v343_v26  ;;  %1388 = vmatpush1.msra.mxu1 %v343_v26  ;;  %v1968_v21 = vld [vmem:[%s2313_s2] sm:$0x7]  ;;  %s1540_s7 = sshll.u32 %s1685_s12, 4  ;;  %s1541_s7 = int_to_ptr.vmem [resolvable:$false] %s1540_s7 }
  0x61   : > { %425 = vmatprep.subr.mxu0 %v341_v27  ;;  %1373 = vmatprep.subr.mxu1 %v341_v27  ;;  %v1975_v23 = vrot.slane %v1968_v21, %v390_v22  ;;  %p1543_p3 = scmp.lt.s32.totalorder %s2184_s16, %s1541_s7 }
  0x62   : > { %426 = vmatpush1.msra.mxu0 %v340_v28  ;;  %1389 = vmatpush1.msra.mxu1 %v340_v28 }
  0x63   : > { %427 = vmatprep.subr.mxu0 %v338_v29  ;;  %1374 = vmatprep.subr.mxu1 %v338_v29 }
  0x64   : > { %428 = vmatpush1.msra.mxu0 %v337_v30  ;;  %1390 = vmatpush1.msra.mxu1 %v337_v30 }
  0x65   : > { %429 = vmatprep.subr.mxu0 %v335_v31  ;;  %1375 = vmatprep.subr.mxu1 %v335_v31 }
  0x66   : > { %430 = vmatpush1.msra.mxu0 %v334_v32  ;;  %1391 = vmatpush1.msra.mxu1 %v334_v32 }
  0x67   : > { %464 = vmatmul.mubr.f32.vlgmr.msra.gmra.mxu0 %v1853_v33  ;;  %608 = vmatmul.mubr.f32.vlgmr.msra.gmra.mxu1 %v1856_v34 }
  0x68   : > { %1280 = vmatprep.subr.mxu1 %v381_v35  ;;  %469 = vmatprep.mubr.f32.mxu0 %v1684_v0 }
  0x69   : > { %1281 = vmatpush3.msra.mxu1 %v381_v35  ;;  %613 = vmatprep.mubr.f32.mxu1 %v1684_v0 }
  0x6a   : > { %1282 = vmatprep.subr.mxu1 %v378_v36 }
  0x6b   : > { %1283 = vmatpush3.msra.mxu1 %v378_v36  ;;  %470 = vmatmul.mubr.f32.gmra.mxu0 %v1862_v37 }
  0x6c   : > { %614 = vmatmul.mubr.f32.gmra.mxu1 %v1866_v38  ;;  %1284 = vmatprep.subr.mxu1 %v375_v39 }
  0x6d   : > { %1285 = vmatpush3.msra.mxu1 %v375_v39  ;;  %475 = vmatprep.mubr.f32.mxu0 %v1684_v0 }
  0x6e   : > { %1286 = vmatprep.subr.mxu1 %v372_v40  ;;  %619 = vmatprep.mubr.f32.mxu1 %v1684_v0 }
  0x6f   : > { %1287 = vmatpush3.msra.mxu1 %v372_v40  ;;  %476 = vmatmul.mubr.f32.gmra.mxu0 %v1871_v41 }
  0x70   : > { %620 = vmatmul.mubr.f32.gmra.mxu1 %v1875_v42  ;;  %1288 = vmatprep.subr.mxu1 %v369_v43 }
  0x71   : > { %1289 = vmatpush3.msra.mxu1 %v369_v43  ;;  %481 = vmatprep.mubr.f32.mxu0 %v1684_v0 }
  0x72   : > { %1290 = vmatprep.subr.mxu1 %v366_v44  ;;  %625 = vmatprep.mubr.f32.mxu1 %v1684_v0 }
  0x73   : > { %1291 = vmatpush3.msra.mxu1 %v366_v44  ;;  %482 = vmatmul.mubr.f32.gmra.mxu0 %v1881_v45 }
  0x74   : > { %626 = vmatmul.mubr.f32.gmra.mxu1 %v1885_v46  ;;  %1292 = vmatprep.subr.mxu1 %v363_v47 }
  0x75   : > { %1293 = vmatpush3.msra.mxu1 %v363_v47  ;;  %487 = vmatprep.mubr.f32.mxu0 %v1684_v0 }
  0x76   : > { %1294 = vmatprep.subr.mxu1 %v360_v48  ;;  %631 = vmatprep.mubr.f32.mxu1 %v1684_v0 }
  0x77   : > { %1295 = vmatpush3.msra.mxu1 %v360_v48  ;;  %488 = vmatmul.mubr.f32.gmra.mxu0 %v306_v49 }
  0x78   : > { %632 = vmatmul.mubr.f32.gmra.mxu1 %v1893_v50  ;;  %1296 = vmatprep.subr.mxu1 %v357_v51 }
  0x79   : > { %1297 = vmatpush3.msra.mxu1 %v357_v51  ;;  %493 = vmatprep.mubr.f32.mxu0 %v1684_v0 }
  0x7a   : > { %1298 = vmatprep.subr.mxu1 %v354_v52  ;;  %637 = vmatprep.mubr.f32.mxu1 %v1684_v0 }
  0x7b   : > { %1299 = vmatpush3.msra.mxu1 %v354_v52  ;;  %494 = vmatmul.mubr.f32.gmra.mxu0 %v307_v53 }
  0x7c   : > { %638 = vmatmul.mubr.f32.gmra.mxu1 %v1900_v54  ;;  %1300 = vmatprep.subr.mxu1 %v351_v55 }
  0x7d   : > { %1301 = vmatpush3.msra.mxu1 %v351_v55  ;;  %499 = vmatprep.mubr.f32.mxu0 %v1684_v0 }
  0x7e   : > { %1302 = vmatprep.subr.mxu1 %v348_v56  ;;  %643 = vmatprep.mubr.f32.mxu1 %v1684_v0 }
  0x7f   : > { %1303 = vmatpush3.msra.mxu1 %v348_v56  ;;  %500 = vmatmul.mubr.f32.gmra.mxu0 %v308_v57 }
  0x80   : > { %644 = vmatmul.mubr.f32.gmra.mxu1 %v1907_v58  ;;  %1304 = vmatprep.subr.mxu1 %v345_v59 }
  0x81   : > { %1305 = vmatpush3.msra.mxu1 %v345_v59  ;;  %505 = vmatprep.mubr.f32.mxu0 %v1684_v0 }
  0x82   : > { %1306 = vmatprep.subr.mxu1 %v342_v60  ;;  %649 = vmatprep.mubr.f32.mxu1 %v1684_v0 }
  0x83   : > { %1307 = vmatpush3.msra.mxu1 %v342_v60  ;;  %506 = vmatmul.mubr.f32.gmra.mxu0 %v309_v61 }
  0x84   : > { %650 = vmatmul.mubr.f32.gmra.mxu1 %v1914_v62  ;;  %1308 = vmatprep.subr.mxu1 %v339_v63 }
  0x85   : > { %1309 = vmatpush3.msra.mxu1 %v339_v63  ;;  %511 = vmatprep.mubr.f32.mxu0 %v1684_v0 }
  0x86   : > { %1310 = vmatprep.subr.mxu1 %v336_v1  ;;  %1312 = vmatprep.mubr.f32.mxu1 %v1853_v33 }
  0x87   : > { %1311 = vmatpush3.msra.mxu1 %v336_v1  ;;  %512 = vmatmul.mubr.f32.gmra.mxu0 %v310_v2 }
  0x88   : > { %1313 = vmatmul.mubr.f32.vlgmr.msra.gmra.mxu1 %v1862_v37  ;;  %517 = vmatprep.mubr.f32.mxu0 %v1684_v0 }
  0x89   : > { %1315 = vmatprep.mubr.f32.mxu1 %v1871_v41 }
  0x8b   : > { %518 = vmatmul.mubr.f32.gmra.mxu0 %v311_v3 }
  0x8c   : > { %1316 = vmatmul.mubr.f32.gmra.mxu1 %v1881_v45  ;;  %523 = vmatprep.mubr.f32.mxu0 %v1684_v0 }
  0x8d   : > { %1318 = vmatprep.mubr.f32.mxu1 %v306_v49 }
  0x8f   : > { %524 = vmatmul.mubr.f32.gmra.mxu0 %v312_v4 }
  0x90   : > { %1319 = vmatmul.mubr.f32.gmra.mxu1 %v307_v53  ;;  %529 = vmatprep.mubr.f32.mxu0 %v1684_v0 }
  0x91   : > { %1321 = vmatprep.mubr.f32.mxu1 %v308_v57 }
  0x93   : > { %530 = vmatmul.mubr.f32.gmra.mxu0 %v313_v5 }
  0x94   : > { %1322 = vmatmul.mubr.f32.gmra.mxu1 %v309_v61  ;;  %535 = vmatprep.mubr.f32.mxu0 %v1684_v0 }
  0x95   : > { %1324 = vmatprep.mubr.f32.mxu1 %v310_v2 }
  0x97   : > { %536 = vmatmul.mubr.f32.gmra.mxu0 %v314_v6 }
  0x98   : > { %1325 = vmatmul.mubr.f32.gmra.mxu1 %v311_v3  ;;  %541 = vmatprep.mubr.f32.mxu0 %v1684_v0 }
  0x99   : > { %1327 = vmatprep.mubr.f32.mxu1 %v312_v4 }
  0x9b   : > { %542 = vmatmul.mubr.f32.gmra.mxu0 %v315_v7 }
  0x9c   : > { %1328 = vmatmul.mubr.f32.gmra.mxu1 %v313_v5  ;;  %547 = vmatprep.mubr.f32.mxu0 %v1684_v0 }
  0x9d   : > { %1330 = vmatprep.mubr.f32.mxu1 %v314_v6 }
  0x9f   : > { %548 = vmatmul.mubr.f32.gmra.mxu0 %v316_v8 }
  0xa0   : > { %1331 = vmatmul.mubr.f32.gmra.mxu1 %v315_v7  ;;  %553 = vmatprep.mubr.f32.mxu0 %v1684_v0 }
  0xa1   : > { %1333 = vmatprep.mubr.f32.mxu1 %v316_v8 }
  0xa3   : > { %554 = vmatmul.mubr.f32.gmra.mxu0 %v317_v9 }
  0xa4   : > { %1334 = vmatmul.mubr.f32.gmra.mxu1 %v317_v9  ;;  %559 = vmatprep.mubr.f32.mxu0 %v1684_v0 }
  0xa5   : > { %1336 = vmatprep.mubr.f32.mxu1 %v318_v10 }
  0xa7   : > { %560 = vmatmul.mubr.f32.gmra.mxu0 %v318_v10 }
  0xa8   : > { %1337 = vmatmul.mubr.f32.gmra.mxu1 %v319_v11  ;;  %565 = vmatprep.mubr.f32.mxu0 %v1684_v0 }
  0xa9   : > { %1339 = vmatprep.mubr.f32.mxu1 %v320_v12 }
  0xab   : > { %566 = vmatmul.mubr.f32.gmra.mxu0 %v319_v11 }
  0xac   : > { %1340 = vmatmul.mubr.f32.gmra.mxu1 %v321_v13  ;;  %571 = vmatprep.mubr.f32.mxu0 %v1684_v0 }
  0xad   : > { %1342 = vmatprep.mubr.f32.mxu1 %v322_v14 }
  0xaf   : > { %572 = vmatmul.mubr.f32.gmra.mxu0 %v320_v12 }
  0xb0   : > { %1343 = vmatmul.mubr.f32.gmra.mxu1 %v323_v15  ;;  %577 = vmatprep.mubr.f32.mxu0 %v1684_v0 }
  0xb1   : > { %1345 = vmatprep.mubr.f32.mxu1 %v324_v16 }
  0xb3   : > { %578 = vmatmul.mubr.f32.gmra.mxu0 %v321_v13 }
  0xb4   : > { %1346 = vmatmul.mubr.f32.gmra.mxu1 %v325_v17  ;;  %583 = vmatprep.mubr.f32.mxu0 %v1684_v0 }
  0xb5   : > { %1348 = vmatprep.mubr.f32.mxu1 %v1856_v34 }
  0xb7   : > { %584 = vmatmul.mubr.f32.gmra.mxu0 %v322_v14  ;;  %v394_v14 = vsub.s32 2, %v1962_v19 }
  0xb8   : > { %1349 = vmatmul.mubr.f32.gmra.mxu1 %v1866_v38  ;;  %589 = vmatprep.mubr.f32.mxu0 %v1684_v0 }
  0xb9   : > { %1351 = vmatprep.mubr.f32.mxu1 %v1875_v42 }
  0xbb   : > { %590 = vmatmul.mubr.f32.gmra.mxu0 %v323_v15 }
  0xbc   : > { %1352 = vmatmul.mubr.f32.gmra.mxu1 %v1885_v46  ;;  %595 = vmatprep.mubr.f32.mxu0 %v1684_v0 }
  0xbd   : > { %1354 = vmatprep.mubr.f32.mxu1 %v1893_v50 }
  0xbf   : > { %596 = vmatmul.mubr.f32.gmra.mxu0 %v324_v16 }
  0xc0   : > { %1355 = vmatmul.mubr.f32.gmra.mxu1 %v1900_v54  ;;  %601 = vmatprep.mubr.f32.mxu0 %v1684_v0  ;;  %v1972_v0 = vrot.slane %v1968_v21, %v386_v20 }
  0xc1   : > { %1357 = vmatprep.mubr.f32.mxu1 %v1907_v58 }
  0xc3   : > { %602 = vmatmul.mubr.f32.gmra.mxu0 %v325_v17 }
  0xc4   : > { %1358 = vmatmul.mubr.f32.gmra.mxu1 %v1914_v62 }
 0x127   : > { %v465_v24 = vpop.f32.mrf.mxu0  ;;  %v609_v25 = vpop.f32.mrf.mxu1 }
 0x128   : > { %v466_v26 = vadd.f32 %v465_v24, %v1972_v0  ;;  %v610_v27 = vadd.f32 %v609_v25, %v1972_v0  ;;  %v2043_v25 = vrot.slane %v1968_v21, %v394_v14 }
 0x129   : > { %v467_v28 = vpop.f32.mrf.mxu0  ;;  %v611_v29 = vpop.f32.mrf.mxu1 }
 0x12a   : > { %881 = vst [vmem:[%s1980_s26] sm:$0xff] %v466_v26  ;;  %905 = vst [vmem:[%s1980_s26 + $0xc0] sm:$0xff] %v610_v27  ;;  %v468_v30 = vadd.f32 %v467_v28, %v1975_v23  ;;  %v612_v31 = vadd.f32 %v611_v29, %v1975_v23 }
 0x12b   : > { %v471_v32 = vpop.f32.mrf.mxu0 }
 0x12c   : > { %913 = vst [vmem:[%s1987_s28] sm:$0xff] %v468_v30  ;;  %937 = vst [vmem:[%s1987_s28 + $0xc0] sm:$0xff] %v612_v31  ;;  %v472_v33 = vadd.f32 %v471_v32, %v1972_v0  ;;  %v615_v34 = vpop.f32.mrf.mxu1 }
 0x12d   : > { %v616_v35 = vadd.f32 %v615_v34, %v1972_v0  ;;  %v473_v36 = vpop.f32.mrf.mxu0 }
 0x12e   : > { %882 = vst [vmem:[%s1980_s26 + $0x8] sm:$0xff] %v472_v33  ;;  %v474_v37 = vadd.f32 %v473_v36, %v1975_v23  ;;  %v617_v38 = vpop.f32.mrf.mxu1 }
 0x12f   : > { %906 = vst [vmem:[%s1980_s26 + $0xc8] sm:$0xff] %v616_v35  ;;  %v618_v39 = vadd.f32 %v617_v38, %v1975_v23  ;;  %v477_v40 = vpop.f32.mrf.mxu0 }
 0x130   : > { %914 = vst [vmem:[%s1987_s28 + $0x8] sm:$0xff] %v474_v37  ;;  %v478_v41 = vadd.f32 %v477_v40, %v1972_v0  ;;  %v621_v42 = vpop.f32.mrf.mxu1 }
 0x131   : > { %938 = vst [vmem:[%s1987_s28 + $0xc8] sm:$0xff] %v618_v39  ;;  %v622_v43 = vadd.f32 %v621_v42, %v1972_v0  ;;  %v479_v44 = vpop.f32.mrf.mxu0 }
 0x132   : > { %883 = vst [vmem:[%s1980_s26 + $0x10] sm:$0xff] %v478_v41  ;;  %v480_v45 = vadd.f32 %v479_v44, %v1975_v23  ;;  %v623_v46 = vpop.f32.mrf.mxu1 }
 0x133   : > { %907 = vst [vmem:[%s1980_s26 + $0xd0] sm:$0xff] %v622_v43  ;;  %v624_v47 = vadd.f32 %v623_v46, %v1975_v23  ;;  %v483_v48 = vpop.f32.mrf.mxu0 }
 0x134   : > { %915 = vst [vmem:[%s1987_s28 + $0x10] sm:$0xff] %v480_v45  ;;  %v484_v49 = vadd.f32 %v483_v48, %v1972_v0  ;;  %v627_v50 = vpop.f32.mrf.mxu1 }
 0x135   : > { %939 = vst [vmem:[%s1987_s28 + $0xd0] sm:$0xff] %v624_v47  ;;  %v628_v51 = vadd.f32 %v627_v50, %v1972_v0  ;;  %v485_v52 = vpop.f32.mrf.mxu0 }
 0x136   : > { %884 = vst [vmem:[%s1980_s26 + $0x18] sm:$0xff] %v484_v49  ;;  %v486_v53 = vadd.f32 %v485_v52, %v1975_v23  ;;  %v629_v54 = vpop.f32.mrf.mxu1 }
 0x137   : > { %908 = vst [vmem:[%s1980_s26 + $0xd8] sm:$0xff] %v628_v51  ;;  %v630_v55 = vadd.f32 %v629_v54, %v1975_v23  ;;  %v489_v56 = vpop.f32.mrf.mxu0 }
 0x138   : > { %916 = vst [vmem:[%s1987_s28 + $0x18] sm:$0xff] %v486_v53  ;;  %v490_v57 = vadd.f32 %v489_v56, %v1972_v0  ;;  %v633_v58 = vpop.f32.mrf.mxu1 }
 0x139   : > { %940 = vst [vmem:[%s1987_s28 + $0xd8] sm:$0xff] %v630_v55  ;;  %v634_v59 = vadd.f32 %v633_v58, %v1972_v0  ;;  %v491_v60 = vpop.f32.mrf.mxu0 }
 0x13a   : > { %885 = vst [vmem:[%s1980_s26 + $0x20] sm:$0xff] %v490_v57  ;;  %v492_v61 = vadd.f32 %v491_v60, %v1975_v23  ;;  %v635_v62 = vpop.f32.mrf.mxu1 }
 0x13b   : > { %909 = vst [vmem:[%s1980_s26 + $0xe0] sm:$0xff] %v634_v59  ;;  %v636_v63 = vadd.f32 %v635_v62, %v1975_v23  ;;  %v495_v1 = vpop.f32.mrf.mxu0 }
 0x13c   : > { %917 = vst [vmem:[%s1987_s28 + $0x20] sm:$0xff] %v492_v61  ;;  %v496_v2 = vadd.f32 %v495_v1, %v1972_v0  ;;  %v639_v3 = vpop.f32.mrf.mxu1 }
 0x13d   : > { %941 = vst [vmem:[%s1987_s28 + $0xe0] sm:$0xff] %v636_v63  ;;  %v640_v4 = vadd.f32 %v639_v3, %v1972_v0  ;;  %v497_v5 = vpop.f32.mrf.mxu0 }
 0x13e   : > { %886 = vst [vmem:[%s1980_s26 + $0x28] sm:$0xff] %v496_v2  ;;  %v498_v6 = vadd.f32 %v497_v5, %v1975_v23  ;;  %v641_v7 = vpop.f32.mrf.mxu1 }
 0x13f   : > { %910 = vst [vmem:[%s1980_s26 + $0xe8] sm:$0xff] %v640_v4  ;;  %v642_v8 = vadd.f32 %v641_v7, %v1975_v23  ;;  %v501_v9 = vpop.f32.mrf.mxu0 }
 0x140   : > { %918 = vst [vmem:[%s1987_s28 + $0x28] sm:$0xff] %v498_v6  ;;  %v502_v10 = vadd.f32 %v501_v9, %v1972_v0  ;;  %v645_v11 = vpop.f32.mrf.mxu1 }
 0x141   : > { %942 = vst [vmem:[%s1987_s28 + $0xe8] sm:$0xff] %v642_v8  ;;  %v646_v12 = vadd.f32 %v645_v11, %v1972_v0  ;;  %v503_v13 = vpop.f32.mrf.mxu0 }
 0x142   : > { %887 = vst [vmem:[%s1980_s26 + $0x30] sm:$0xff] %v502_v10  ;;  %v504_v15 = vadd.f32 %v503_v13, %v1975_v23  ;;  %v647_v16 = vpop.f32.mrf.mxu1 }
 0x143   : > { %911 = vst [vmem:[%s1980_s26 + $0xf0] sm:$0xff] %v646_v12  ;;  %v648_v17 = vadd.f32 %v647_v16, %v1975_v23  ;;  %v507_v18 = vpop.f32.mrf.mxu0 }
 0x144   : > { %919 = vst [vmem:[%s1987_s28 + $0x30] sm:$0xff] %v504_v15  ;;  %v508_v20 = vadd.f32 %v507_v18, %v1972_v0  ;;  %v651_v22 = vpop.f32.mrf.mxu1 }
 0x145   : > { %943 = vst [vmem:[%s1987_s28 + $0xf0] sm:$0xff] %v648_v17  ;;  %v652_v24 = vadd.f32 %v651_v22, %v1972_v0  ;;  %v509_v19 = vpop.f32.mrf.mxu0 }
 0x146   : > { %888 = vst [vmem:[%s1980_s26 + $0x38] sm:$0xff] %v508_v20  ;;  %v510_v26 = vadd.f32 %v509_v19, %v1975_v23  ;;  %v653_v27 = vpop.f32.mrf.mxu1 }
 0x147   : > { %912 = vst [vmem:[%s1980_s26 + $0xf8] sm:$0xff] %v652_v24  ;;  %v654_v28 = vadd.f32 %v653_v27, %v1975_v23  ;;  %v513_v29 = vpop.f32.mrf.mxu0 }
 0x148   : > { %920 = vst [vmem:[%s1987_s28 + $0x38] sm:$0xff] %v510_v26  ;;  %v514_v30 = vadd.f32 %v513_v29, %v1972_v0  ;;  %v1314_v31 = vpop.f32.mrf.mxu1 }
 0x149   : > { %944 = vst [vmem:[%s1987_s28 + $0xf8] sm:$0xff] %v654_v28  ;;  %v728_v32 = vadd.f32 %v1314_v31, %v2043_v25  ;;  %v515_v21 = vpop.f32.mrf.mxu0 }
 0x14a   : > { %889 = vst [vmem:[%s1980_s26 + $0x40] sm:$0xff] %v514_v30  ;;  %v516_v33 = vadd.f32 %v515_v21, %v1975_v23  ;;  %v722_v34 = vpop.f32.mrf.mxu1 }
 0x14b   : > { %946 = vst [vmem:[%s2056_s10 + $0x8] sm:$0xff] %v728_v32  ;;  %v723_v35 = vadd.f32 %v722_v34, %v2043_v25  ;;  %v519_v36 = vpop.f32.mrf.mxu0 }
 0x14c   : > { %921 = vst [vmem:[%s1987_s28 + $0x40] sm:$0xff] %v516_v33  ;;  %v520_v37 = vadd.f32 %v519_v36, %v1972_v0  ;;  %v1317_v38 = vpop.f32.mrf.mxu1 }
 0x14d   : > { %945 = vst [vmem:[%s2056_s10] sm:$0xff] %v723_v35  ;;  %v738_v39 = vadd.f32 %v1317_v38, %v2043_v25  ;;  %v521_v40 = vpop.f32.mrf.mxu0 }
 0x14e   : > { %890 = vst [vmem:[%s1980_s26 + $0x48] sm:$0xff] %v520_v37  ;;  %v522_v41 = vadd.f32 %v521_v40, %v1975_v23  ;;  %v732_v42 = vpop.f32.mrf.mxu1 }
 0x14f   : > { %948 = vst [vmem:[%s2056_s10 + $0x18] sm:$0xff] %v738_v39  ;;  %v733_v43 = vadd.f32 %v732_v42, %v2043_v25  ;;  %v525_v44 = vpop.f32.mrf.mxu0 }
 0x150   : > { %922 = vst [vmem:[%s1987_s28 + $0x48] sm:$0xff] %v522_v41  ;;  %v526_v45 = vadd.f32 %v525_v44, %v1972_v0  ;;  %v1320_v46 = vpop.f32.mrf.mxu1 }
 0x151   : > { %947 = vst [vmem:[%s2056_s10 + $0x10] sm:$0xff] %v733_v43  ;;  %v748_v47 = vadd.f32 %v1320_v46, %v2043_v25  ;;  %v527_v48 = vpop.f32.mrf.mxu0 }
 0x152   : > { %891 = vst [vmem:[%s1980_s26 + $0x50] sm:$0xff] %v526_v45  ;;  %v528_v49 = vadd.f32 %v527_v48, %v1975_v23  ;;  %v742_v50 = vpop.f32.mrf.mxu1 }
 0x153   : > { %950 = vst [vmem:[%s2056_s10 + $0x28] sm:$0xff] %v748_v47  ;;  %v743_v51 = vadd.f32 %v742_v50, %v2043_v25  ;;  %v531_v52 = vpop.f32.mrf.mxu0 }
 0x154   : > { %923 = vst [vmem:[%s1987_s28 + $0x50] sm:$0xff] %v528_v49  ;;  %v532_v53 = vadd.f32 %v531_v52, %v1972_v0  ;;  %v1323_v54 = vpop.f32.mrf.mxu1 }
 0x155   : > { %949 = vst [vmem:[%s2056_s10 + $0x20] sm:$0xff] %v743_v51  ;;  %v758_v55 = vadd.f32 %v1323_v54, %v2043_v25  ;;  %v533_v56 = vpop.f32.mrf.mxu0 }
 0x156   : > { %892 = vst [vmem:[%s1980_s26 + $0x58] sm:$0xff] %v532_v53  ;;  %v534_v57 = vadd.f32 %v533_v56, %v1975_v23  ;;  %v752_v58 = vpop.f32.mrf.mxu1 }
 0x157   : > { %952 = vst [vmem:[%s2056_s10 + $0x38] sm:$0xff] %v758_v55  ;;  %v753_v59 = vadd.f32 %v752_v58, %v2043_v25  ;;  %v537_v60 = vpop.f32.mrf.mxu0 }
 0x158   : > { %924 = vst [vmem:[%s1987_s28 + $0x58] sm:$0xff] %v534_v57  ;;  %v538_v61 = vadd.f32 %v537_v60, %v1972_v0  ;;  %v1326_v62 = vpop.f32.mrf.mxu1 }
 0x159   : > { %951 = vst [vmem:[%s2056_s10 + $0x30] sm:$0xff] %v753_v59  ;;  %v768_v63 = vadd.f32 %v1326_v62, %v2043_v25  ;;  %v539_v1 = vpop.f32.mrf.mxu0 }
 0x15a   : > { %893 = vst [vmem:[%s1980_s26 + $0x60] sm:$0xff] %v538_v61  ;;  %v540_v2 = vadd.f32 %v539_v1, %v1975_v23  ;;  %v762_v3 = vpop.f32.mrf.mxu1 }
 0x15b   : > { %954 = vst [vmem:[%s2056_s10 + $0x48] sm:$0xff] %v768_v63  ;;  %v763_v4 = vadd.f32 %v762_v3, %v2043_v25  ;;  %v543_v5 = vpop.f32.mrf.mxu0 }
 0x15c   : > { %925 = vst [vmem:[%s1987_s28 + $0x60] sm:$0xff] %v540_v2  ;;  %v544_v6 = vadd.f32 %v543_v5, %v1972_v0  ;;  %v1329_v7 = vpop.f32.mrf.mxu1 }
 0x15d   : > { %953 = vst [vmem:[%s2056_s10 + $0x40] sm:$0xff] %v763_v4  ;;  %v778_v8 = vadd.f32 %v1329_v7, %v2043_v25  ;;  %v545_v9 = vpop.f32.mrf.mxu0 }
 0x15e   : > { %894 = vst [vmem:[%s1980_s26 + $0x68] sm:$0xff] %v544_v6  ;;  %v546_v10 = vadd.f32 %v545_v9, %v1975_v23  ;;  %v772_v11 = vpop.f32.mrf.mxu1 }
 0x15f   : > { %956 = vst [vmem:[%s2056_s10 + $0x58] sm:$0xff] %v778_v8  ;;  %v773_v12 = vadd.f32 %v772_v11, %v2043_v25  ;;  %v549_v13 = vpop.f32.mrf.mxu0 }
 0x160   : > { %926 = vst [vmem:[%s1987_s28 + $0x68] sm:$0xff] %v546_v10  ;;  %v550_v14 = vadd.f32 %v549_v13, %v1972_v0  ;;  %v1332_v15 = vpop.f32.mrf.mxu1 }
 0x161   : > { %955 = vst [vmem:[%s2056_s10 + $0x50] sm:$0xff] %v773_v12  ;;  %v788_v16 = vadd.f32 %v1332_v15, %v2043_v25  ;;  %v551_v17 = vpop.f32.mrf.mxu0 }
 0x162   : > { %895 = vst [vmem:[%s1980_s26 + $0x70] sm:$0xff] %v550_v14  ;;  %v552_v18 = vadd.f32 %v551_v17, %v1975_v23  ;;  %v782_v20 = vpop.f32.mrf.mxu1 }
 0x163   : > { %958 = vst [vmem:[%s2056_s10 + $0x68] sm:$0xff] %v788_v16  ;;  %v783_v22 = vadd.f32 %v782_v20, %v2043_v25  ;;  %v555_v24 = vpop.f32.mrf.mxu0 }
 0x164   : > { %927 = vst [vmem:[%s1987_s28 + $0x70] sm:$0xff] %v552_v18  ;;  %v556_v19 = vadd.f32 %v555_v24, %v1972_v0  ;;  %v1335_v26 = vpop.f32.mrf.mxu1 }
 0x165   : > { %957 = vst [vmem:[%s2056_s10 + $0x60] sm:$0xff] %v783_v22  ;;  %v798_v27 = vadd.f32 %v1335_v26, %v2043_v25  ;;  %v557_v28 = vpop.f32.mrf.mxu0 }
 0x166   : > { %896 = vst [vmem:[%s1980_s26 + $0x78] sm:$0xff] %v556_v19  ;;  %v558_v29 = vadd.f32 %v557_v28, %v1975_v23  ;;  %v792_v30 = vpop.f32.mrf.mxu1 }
 0x167   : > { %960 = vst [vmem:[%s2056_s10 + $0x78] sm:$0xff] %v798_v27  ;;  %v793_v31 = vadd.f32 %v792_v30, %v2043_v25  ;;  %v561_v32 = vpop.f32.mrf.mxu0 }
 0x168   : > { %928 = vst [vmem:[%s1987_s28 + $0x78] sm:$0xff] %v558_v29  ;;  %v562_v21 = vadd.f32 %v561_v32, %v1972_v0  ;;  %v1338_v33 = vpop.f32.mrf.mxu1 }
 0x169   : > { %959 = vst [vmem:[%s2056_s10 + $0x70] sm:$0xff] %v793_v31  ;;  %v808_v34 = vadd.f32 %v1338_v33, %v2043_v25  ;;  %v563_v35 = vpop.f32.mrf.mxu0 }
 0x16a   : > { %897 = vst [vmem:[%s1980_s26 + $0x80] sm:$0xff] %v562_v21  ;;  %v564_v36 = vadd.f32 %v563_v35, %v1975_v23  ;;  %v802_v37 = vpop.f32.mrf.mxu1 }
 0x16b   : > { %962 = vst [vmem:[%s2056_s10 + $0x88] sm:$0xff] %v808_v34  ;;  %v803_v38 = vadd.f32 %v802_v37, %v2043_v25  ;;  %v567_v39 = vpop.f32.mrf.mxu0 }
 0x16c   : > { %929 = vst [vmem:[%s1987_s28 + $0x80] sm:$0xff] %v564_v36  ;;  %v568_v40 = vadd.f32 %v567_v39, %v1972_v0  ;;  %v1341_v41 = vpop.f32.mrf.mxu1 }
 0x16d   : > { %961 = vst [vmem:[%s2056_s10 + $0x80] sm:$0xff] %v803_v38  ;;  %v818_v42 = vadd.f32 %v1341_v41, %v2043_v25  ;;  %v569_v43 = vpop.f32.mrf.mxu0 }
 0x16e   : > { %898 = vst [vmem:[%s1980_s26 + $0x88] sm:$0xff] %v568_v40  ;;  %v570_v44 = vadd.f32 %v569_v43, %v1975_v23  ;;  %v812_v45 = vpop.f32.mrf.mxu1 }
 0x16f   : > { %964 = vst [vmem:[%s2056_s10 + $0x98] sm:$0xff] %v818_v42  ;;  %v813_v46 = vadd.f32 %v812_v45, %v2043_v25  ;;  %v573_v47 = vpop.f32.mrf.mxu0 }
 0x170   : > { %930 = vst [vmem:[%s1987_s28 + $0x88] sm:$0xff] %v570_v44  ;;  %v574_v48 = vadd.f32 %v573_v47, %v1972_v0  ;;  %v1344_v49 = vpop.f32.mrf.mxu1 }
 0x171   : > { %963 = vst [vmem:[%s2056_s10 + $0x90] sm:$0xff] %v813_v46  ;;  %v828_v50 = vadd.f32 %v1344_v49, %v2043_v25  ;;  %v575_v51 = vpop.f32.mrf.mxu0 }
 0x172   : > { %899 = vst [vmem:[%s1980_s26 + $0x90] sm:$0xff] %v574_v48  ;;  %v576_v52 = vadd.f32 %v575_v51, %v1975_v23  ;;  %v822_v53 = vpop.f32.mrf.mxu1 }
 0x173   : > { %966 = vst [vmem:[%s2056_s10 + $0xa8] sm:$0xff] %v828_v50  ;;  %v823_v54 = vadd.f32 %v822_v53, %v2043_v25  ;;  %v579_v55 = vpop.f32.mrf.mxu0 }
 0x174   : > { %931 = vst [vmem:[%s1987_s28 + $0x90] sm:$0xff] %v576_v52  ;;  %v580_v56 = vadd.f32 %v579_v55, %v1972_v0  ;;  %v1347_v57 = vpop.f32.mrf.mxu1 }
 0x175   : > { %965 = vst [vmem:[%s2056_s10 + $0xa0] sm:$0xff] %v823_v54  ;;  %v838_v58 = vadd.f32 %v1347_v57, %v2043_v25  ;;  %v581_v59 = vpop.f32.mrf.mxu0 }
 0x176   : > { %900 = vst [vmem:[%s1980_s26 + $0x98] sm:$0xff] %v580_v56  ;;  %v582_v60 = vadd.f32 %v581_v59, %v1975_v23  ;;  %v832_v61 = vpop.f32.mrf.mxu1 }
 0x177   : > { %968 = vst [vmem:[%s2056_s10 + $0xb8] sm:$0xff] %v838_v58  ;;  %v833_v62 = vadd.f32 %v832_v61, %v2043_v25  ;;  %v585_v63 = vpop.f32.mrf.mxu0 }
 0x178   : > { %932 = vst [vmem:[%s1987_s28 + $0x98] sm:$0xff] %v582_v60  ;;  %v586_v1 = vadd.f32 %v585_v63, %v1972_v0  ;;  %v1350_v2 = vpop.f32.mrf.mxu1 }
 0x179   : > { %967 = vst [vmem:[%s2056_s10 + $0xb0] sm:$0xff] %v833_v62  ;;  %v848_v3 = vadd.f32 %v1350_v2, %v2043_v25  ;;  %v587_v4 = vpop.f32.mrf.mxu0 }
 0x17a   : > { %901 = vst [vmem:[%s1980_s26 + $0xa0] sm:$0xff] %v586_v1  ;;  %v588_v5 = vadd.f32 %v587_v4, %v1975_v23  ;;  %v842_v6 = vpop.f32.mrf.mxu1 }
 0x17b   : > { %970 = vst [vmem:[%s2056_s10 + $0xc8] sm:$0xff] %v848_v3  ;;  %v843_v7 = vadd.f32 %v842_v6, %v2043_v25  ;;  %v591_v8 = vpop.f32.mrf.mxu0 }
 0x17c   : > { %933 = vst [vmem:[%s1987_s28 + $0xa0] sm:$0xff] %v588_v5  ;;  %v592_v9 = vadd.f32 %v591_v8, %v1972_v0  ;;  %v1353_v10 = vpop.f32.mrf.mxu1 }
 0x17d   : > { %969 = vst [vmem:[%s2056_s10 + $0xc0] sm:$0xff] %v843_v7  ;;  %v858_v11 = vadd.f32 %v1353_v10, %v2043_v25  ;;  %v593_v12 = vpop.f32.mrf.mxu0 }
 0x17e   : > { %902 = vst [vmem:[%s1980_s26 + $0xa8] sm:$0xff] %v592_v9  ;;  %v594_v13 = vadd.f32 %v593_v12, %v1975_v23  ;;  %v852_v14 = vpop.f32.mrf.mxu1 }
 0x17f   : > { %972 = vst [vmem:[%s2056_s10 + $0xd8] sm:$0xff] %v858_v11  ;;  %v853_v15 = vadd.f32 %v852_v14, %v2043_v25  ;;  %v597_v16 = vpop.f32.mrf.mxu0 }
 0x180   : > { %934 = vst [vmem:[%s1987_s28 + $0xa8] sm:$0xff] %v594_v13  ;;  %v598_v17 = vadd.f32 %v597_v16, %v1972_v0  ;;  %v1356_v18 = vpop.f32.mrf.mxu1 }
 0x181   : > { %971 = vst [vmem:[%s2056_s10 + $0xd0] sm:$0xff] %v853_v15  ;;  %v868_v20 = vadd.f32 %v1356_v18, %v2043_v25  ;;  %v599_v22 = vpop.f32.mrf.mxu0 }
 0x182   : > { %903 = vst [vmem:[%s1980_s26 + $0xb0] sm:$0xff] %v598_v17  ;;  %v600_v24 = vadd.f32 %v599_v22, %v1975_v23  ;;  %v862_v19 = vpop.f32.mrf.mxu1 }
 0x183   : > { %974 = vst [vmem:[%s2056_s10 + $0xe8] sm:$0xff] %v868_v20  ;;  %v863_v26 = vadd.f32 %v862_v19, %v2043_v25  ;;  %v603_v27 = vpop.f32.mrf.mxu0 }
 0x184   : > { %935 = vst [vmem:[%s1987_s28 + $0xb0] sm:$0xff] %v600_v24  ;;  %v604_v28 = vadd.f32 %v603_v27, %v1972_v0  ;;  %v1359_v29 = vpop.f32.mrf.mxu1 }
 0x185   : > { %973 = vst [vmem:[%s2056_s10 + $0xe0] sm:$0xff] %v863_v26  ;;  %v878_v30 = vadd.f32 %v1359_v29, %v2043_v25  ;;  %v605_v31 = vpop.f32.mrf.mxu0 }
 0x186   : > { %904 = vst [vmem:[%s1980_s26 + $0xb8] sm:$0xff] %v604_v28  ;;  %v606_v0 = vadd.f32 %v605_v31, %v1975_v23  ;;  %v872_v32 = vpop.f32.mrf.mxu1  ;;  %s1542_s26 = scalar_lea.vmem %s1541_s7, 8192 }
 0x187   : > { %976 = vst [vmem:[%s2056_s10 + $0xf8] sm:$0xff] %v878_v30  ;;  %v873_v21 = vadd.f32 %v872_v32, %v2043_v25  ;;  %p1544_p5 = scmp.lt.s32.totalorder %s1542_s26, %s1536_s8 }
 0x189   : > { %p1545_p7 = por %p1544_p5, %p1543_p3 }
 0x18b   : > { %p1546_p2 = pnand %p1545_p7, %p1539_p12 }
 0x18d   : > { %1549 = shalt.err (!%p1546_p2)
}
 0x18e   : > { %s1550_s1 = scalar_lea.hbm %s2182_s29, 4096  ;;  %s1554_s12 = scalar_lea.hbm %s2314_s3, 8192 }
 0x18f   : > { %p1551_p6 = scmp.ne.s32.totalorder %s2182_s29, %s1550_s1  ;;  %p1555_p11 = scmp.lt.s32.totalorder %s2182_s29, %s2314_s3 }
 0x190   : > { %p1556_p1 = scmp.lt.s32.totalorder %s1554_s12, %s1550_s1 }
 0x191   : > { %p1552_p9 = pnand %p1551_p6, %p1805_p0 }
 0x192   : > { %p1557_p8 = por %p1556_p1, %p1555_p11 }
 0x193   : > { %p1553_p13 = pneg %p1552_p9 }
 0x195   : > { %p1558_p4 = pnand %p1557_p8, %p1553_p13 }
 0x197   : > { %1561 = shalt.err (!%p1558_p4)
}
 0x198   : > { %s1686_s8 = smov 128   ;;  %s1687_s11 = smov 8   ;;  %936 = vst [vmem:[%s1987_s28 + $0xb8] sm:$0xff] %v606_v0  ;;  %975 = vst [vmem:[%s2056_s10 + $0xf0] sm:$0xff] %v873_v21 }
 0x199   : > { %s2335_s0 = scalar_lea.sflag [#allocation4], %s1833_s17  ;;  %s2336_s14 = sand.u32 1, %s1751_s24  }
 0x19a   : > { %1398 = dma.vmem_to_hbm [thread:$0]  (%p1805_p0), %s2184_s16, 4096, %s2182_s29, %s2335_s0, %s1686_s8, %s1686_s8, %s1687_s11  }
 0x19b   : > { %s2236_s7 = scalar_lea.sflag [#allocation9], %s2336_s14  ;;  %s1562_s26 = scalar_lea.vmem %s2200_s13, 4096 }
 0x19c   : > { %p1563_p10 = scmp.ne.s32.totalorder %s2200_s13, %s1562_s26  ;;  %s1688_s1 = smov [#allocation8]  }
 0x19d   : > { %s1566_s25 = sshll.u32 %s1688_s1, 4  ;;  %s1567_s25 = int_to_ptr.vmem [resolvable:$false] %s1566_s25 }
 0x19e   : > { %p1564_p12 = pnand %p1563_p10, %p1805_p0  ;;  %s1568_s12 = scalar_lea.vmem %s1567_s25, 8192 }
 0x19f   : > { %p1569_p5 = scmp.lt.s32.totalorder %s2200_s13, %s1567_s25  ;;  %p1570_p7 = scmp.lt.s32.totalorder %s1568_s12, %s1562_s26 }
 0x1a0   : > { %p1565_p3 = pneg %p1564_p12 }
 0x1a1   : > { %p1571_p2 = por %p1570_p7, %p1569_p5 }
 0x1a3   : > { %p1572_p6 = pnand %p1571_p2, %p1565_p3 }
 0x1a5   : > { %1575 = shalt.err (!%p1572_p6)
}
 0x1a6   : > { %s1576_s24 = scalar_lea.hbm %s2191_s9, 4096  ;;  %s1580_s10 = scalar_lea.hbm %s2315_s4, 8192 }
 0x1a7   : > { %p1577_p9 = scmp.ne.s32.totalorder %s2191_s9, %s1576_s24  ;;  %p1581_p1 = scmp.lt.s32.totalorder %s2191_s9, %s2315_s4 }
 0x1a8   : > { %p1582_p8 = scmp.lt.s32.totalorder %s1580_s10, %s1576_s24 }
 0x1a9   : > { %p1578_p13 = pnand %p1577_p9, %p1805_p0 }
 0x1aa   : > { %p1583_p4 = por %p1582_p8, %p1581_p1 }
 0x1ab   : > { %p1579_p11 = pneg %p1578_p13 }
 0x1ad   : > { %p1584_p10 = pnand %p1583_p4, %p1579_p11 }
 0x1af   : > { %1587 = shalt.err (!%p1584_p10)
}
 0x1b0   : > { %1399 = dma.vmem_to_hbm [thread:$0]  (%p1805_p0), %s2200_s13, 4096, %s2191_s9, %s2236_s7, %s1686_s8, %s1686_s8, %s1687_s11  }
 0x1b1   : > { %s1588_s0 = scalar_lea.vmem %s2202_s6, 4096  ;;  %s1689_s14 = smov [#allocation10]  }
 0x1b2   : > { %p1589_p12 = scmp.ne.s32.totalorder %s2202_s6, %s1588_s0  ;;  %s1592_s26 = sshll.u32 %s1689_s14, 4  ;;  %s1593_s26 = int_to_ptr.vmem [resolvable:$false] %s1592_s26 }
 0x1b3   : > { %s1594_s1 = scalar_lea.vmem %s1593_s26, 8192  ;;  %p1595_p7 = scmp.lt.s32.totalorder %s2202_s6, %s1593_s26 }
 0x1b4   : > { %p1590_p3 = pnand %p1589_p12, %p1805_p0  ;;  %p1596_p2 = scmp.lt.s32.totalorder %s1594_s1, %s1588_s0 }
 0x1b6   : > { %p1591_p5 = pneg %p1590_p3  ;;  %p1597_p6 = por %p1596_p2, %p1595_p7 }
 0x1b8   : > { %p1598_p9 = pnand %p1597_p6, %p1591_p5 }
 0x1ba   : > { %1601 = shalt.err (!%p1598_p9)
}
 0x1bb   : > { %s1602_s25 = scalar_lea.hbm %s2196_s21, 4096  ;;  %s1606_s12 = scalar_lea.hbm %s2316_s5, 8192 }
 0x1bc   : > { %p1603_p13 = scmp.ne.s32.totalorder %s2196_s21, %s1602_s25  ;;  %p1607_p8 = scmp.lt.s32.totalorder %s2196_s21, %s2316_s5 }
 0x1bd   : > { %p1608_p4 = scmp.lt.s32.totalorder %s1606_s12, %s1602_s25 }
 0x1be   : > { %p1604_p11 = pnand %p1603_p13, %p1805_p0 }
 0x1bf   : > { %p1609_p10 = por %p1608_p4, %p1607_p8 }
 0x1c0   : > { %p1605_p1 = pneg %p1604_p11 }
 0x1c2   : > { %p1610_p12 = pnand %p1609_p10, %p1605_p1 }
 0x1c4   : > { %1613 = shalt.err (!%p1610_p12)
}
 0x1c5   : > { %1400 = dma.vmem_to_hbm [thread:$0]  (%p1805_p0), %s2202_s6, 4096, %s2196_s21, %s2236_s7, %s1686_s8, %s1686_s8, %s1687_s11  }
 0x1c6 PF: > { %s1054_s28 = sand.u32 1, %s1656_s18   ;;  %p2337_p3 = scmp.ne.s32.totalorder %s2323_s27, 0 }
 0x1c7   : > { %p2338_p5 = scmp.ge.s32.totalorder %s1676_s23, 2  ;;  %s1055_s10 = scalar_lea.sflag [#allocation4], %s1054_s28 }
 0x1c9   : > { %p1413_p7 = pnand %p2338_p5, %p2337_p3 }
 0x1cb   : > { %p1414_p2 = pneg %p1413_p7 }
 0x1cd   : > { %1647 = dma.done.wait (%p1414_p2), %s1055_s10, 4096  }
 0x1ce   : > { %1649 = vsyncadd (%p1414_p2), %s1055_s10, 4294963200  ;;  %s2339_s15 = sadd.s32 4294967294, %s1676_s23  }
 0x1cf   : > { %s1063_s16 = sand.u32 1, %s2339_s15  }
 0x1d0   : > { %s1064_s29 = scalar_lea.sflag [#allocation9], %s1063_s16 }
 0x1d1   : > { %1651 = dma.done.wait (%p1414_p2), %s1064_s29, 8192  }
 0x1d2   : > { %1653 = vsyncadd (%p1414_p2), %s1064_s29, 4294959104  ;;  %s26_s23 = sadd.s32 1, %s1676_s23   ;;  %s2340_s27 = sld [smem:[#allocation15_spill]] }
 0x1d3   : > { %p23_p0 = scmp.ge.s32.totalorder %s26_s23, 4   ;;  %s2341_s18 = smov %s1660_s19 }
 0x1d4   : > { %s2342_s19 = smov %s1664_s20  ;;  %s2343_s20 = smov %s1814_s30 }
 0x1d5   : > { %s2344_s21 = smov %s1672_s22  ;;  %25 = sbr.rel (!%p23_p0) target bundleno = 12 (0xc), region = 113 }
 0x1d8   : > { %s2345_s22 = smov %s2340_s27 }
 0x1da   :  { %1078 = vsyncpa [#allocation3], 1 }
 0x1db   :  { %1080 = vsyncpa [#allocation3 + $0x1], 1 }
 0x1dc   :  { %1081 = vsyncpa [#allocation6], 1 }
 0x1dd   :  { %1082 = vsyncpa [#allocation4], 1 }
 0x1de   :  { %1084 = vsyncpa [#allocation4 + $0x1], 1 }
 0x1df   :  { %1085 = vsyncpa [#allocation9], 1 }
 0x1e0   :  { %1087 = vsyncpa [#allocation9 + $0x1], 1 }

</bundles_post_ra>
